<compile_context>
chip_gen: v7x
topology: tpu7x:2x2x1
jax: 0.10.0
libtpu: 0.0.40
codegen_flags: <defaults>
</compile_context>

<pallas_src>
import jax
import jax.numpy as jnp
from jax.experimental import pallas as pl
from jax.experimental.pallas import tpu as pltpu

_MAX_ROWS_PER_TILE = 512   # 512 sublane-rows x 128 lanes = 65536 points per tile


def _cdiv(a, b):
    return -(-a // b)


def _make_kernel(n_points, s_rows, n_preds):
    """Build the fused distance kernel for static (#points, rows-per-tile, #predictions)."""

    def kernel(prm_ref, pc_ref, out_ref):
        # prm_ref: (B, P*12) f32 in SMEM -- per pred p, per row c: [dR[c,0], dR[c,1], dR[c,2], dt[c]]
        # pc_ref : (1, 3, S, 128) f32    -- x/y/z of S*128 points, lane-dense
        # out_ref: (1, 8, 128) f32       -- per-batch partial sums, accumulated over row tiles
        b = pl.program_id(0)
        n = pl.program_id(1)

        @pl.when(n == 0)
        def _():
            out_ref[...] = jnp.zeros_like(out_ref)

        x = pc_ref[0, 0]   # (S, 128)
        y = pc_ref[0, 1]
        z = pc_ref[0, 2]

        # Mask off zero-padded points (they would otherwise contribute |dt|).
        sub = jax.lax.broadcasted_iota(jnp.int32, (s_rows, 128), 0)
        lane = jax.lax.broadcasted_iota(jnp.int32, (s_rows, 128), 1)
        point_idx = n * (s_rows * 128) + sub * 128 + lane
        valid = (point_idx < n_points).astype(jnp.float32)

        total = jnp.zeros((s_rows, 128), jnp.float32)
        for p in range(n_preds):                      # static unroll, pc read once for all preds
            base = p * 12
            for c in range(3):                        # 3 output coordinates -> 3 broadcast FMAs
                a0 = prm_ref[b, base + 4 * c + 0]
                a1 = prm_ref[b, base + 4 * c + 1]
                a2 = prm_ref[b, base + 4 * c + 2]
                dtc = prm_ref[b, base + 4 * c + 3]
                total = total + jnp.abs(a0 * x + a1 * y + a2 * z + dtc)
        total = total * valid

        # Reduce S rows -> 8 rows with sublane-aligned slices (pure vreg adds, no cross-lane work).
        part = total[0:8, :]
        for g in range(1, s_rows // 8):
            part = part + total[8 * g:8 * (g + 1), :]

        out_ref[...] = out_ref[...] + part[None, :, :]

    return kernel


def _fused_abs_sum(pc_rows, params, n_points, s_rows):
    """sum_{b,p,n,c} | pc @ dR_p^T + dt_p |  via one Pallas call."""
    B = pc_rows.shape[0]
    rows_pad = pc_rows.shape[2]
    n_tiles = rows_pad // s_rows
    n_preds = params.shape[1] // 12

    out = pl.pallas_call(
        _make_kernel(n_points, s_rows, n_preds),
        out_shape=jax.ShapeDtypeStruct((B, 8, 128), jnp.float32),
        grid_spec=pltpu.PrefetchScalarGridSpec(
            num_scalar_prefetch=0,
            grid=(B, n_tiles),
            in_specs=[
                # Tiny per-batch transform table: resident in SMEM, no per-step DMA.
                pl.BlockSpec(memory_space=pltpu.MemorySpace.SMEM),
                pl.BlockSpec((1, 3, s_rows, 128), lambda b, n: (b, 0, n, 0)),
            ],
            out_specs=pl.BlockSpec((1, 8, 128), lambda b, n: (b, 0, 0)),
        ),
        compiler_params=pltpu.CompilerParams(
            dimension_semantics=("parallel", "arbitrary"),
        ),
    )(params, pc_rows)

    return jnp.sum(out)


def regression_distance_loss(predictions, ground_truth):
    """JAX/Pallas equivalent of Regression_Distance_Loss.forward.

    predictions:  {'R_pred': (B,3,3) or tuple/list, 't_pred': (B,3) or tuple/list}
    ground_truth: {'R_gt': (B,3,3), 't_gt': (B,3), 'source_pc': (B,N,3)}
    """
    assert 'R_pred' in predictions and 't_pred' in predictions
    assert all(k in ground_truth for k in ('R_gt', 't_gt', 'source_pc'))

    source_pc = ground_truth['source_pc']
    R_gt, t_gt = ground_truth['R_gt'], ground_truth['t_gt']
    R_pred, t_pred = predictions['R_pred'], predictions['t_pred']

    if isinstance(R_pred, (tuple, list)):
        assert len(R_pred) == len(t_pred), 'R and t prediction number must be equal'
        R_list, t_list = list(R_pred), list(t_pred)
    else:
        R_list, t_list = [R_pred], [t_pred]
    n_preds = len(R_list)

    f32 = jnp.float32
    B, N, _ = source_pc.shape

    # Fold GT and predicted transforms (linearity): (pc@Rp^T + tp) - (pc@Rg^T + tg) = pc@dR^T + dt.
    Rg = R_gt.astype(f32)
    tg = t_gt.astype(f32)
    dR = jnp.stack([Rp.astype(f32) - Rg for Rp in R_list], axis=1)        # (B, P, 3, 3)
    dt = jnp.stack([tp.astype(f32) - tg for tp in t_list], axis=1)        # (B, P, 3)
    params = jnp.concatenate([dR, dt[..., None]], axis=-1).reshape(B, n_preds * 12)

    # Lane-dense layout: (B, N, 3) -> (B, 3, rows_pad, 128), zero-padding the point axis.
    rows = max(1, _cdiv(N, 128))
    rows8 = _cdiv(rows, 8) * 8
    n_tiles = _cdiv(rows8, _MAX_ROWS_PER_TILE)
    s_rows = _cdiv(_cdiv(rows8, n_tiles), 8) * 8
    rows_pad = s_rows * n_tiles
    n_pad = rows_pad * 128

    # TODO(synk): if upstream precision allows, stream pc as bf16 and upcast in-kernel to halve
    # HBM traffic (biggest win on v5e); kept f32 here to match reference numerics exactly.
    pc_rows = jnp.swapaxes(source_pc.astype(f32), 1, 2)                    # (B, 3, N)
    pc_rows = jnp.pad(pc_rows, ((0, 0), (0, 0), (0, n_pad - N)))
    pc_rows = pc_rows.reshape(B, 3, rows_pad, 128)

    abs_sum = _fused_abs_sum(pc_rows, params, N, s_rows)
    loss = abs_sum / jnp.asarray(n_preds * B * N * 3, f32)
    return {'loss': loss}


def _reference(predictions, ground_truth):
    """Pure-JAX reference for sanity checking."""
    pc = ground_truth['source_pc'].astype(jnp.float32)
    Rg = ground_truth['R_gt'].astype(jnp.float32)
    tg = ground_truth['t_gt'].astype(jnp.float32)
    gt = jnp.einsum('bnd,bkd->bnk', pc, Rg) + tg[:, None, :]

    def one(Rp, tp):
        pr = jnp.einsum('bnd,bkd->bnk', pc, Rp.astype(jnp.float32)) + \
             tp.astype(jnp.float32)[:, None, :]
        return jnp.mean(jnp.abs(pr - gt))

    Rp, tp = predictions['R_pred'], predictions['t_pred']
    if isinstance(Rp, (tuple, list)):
        return sum(one(r, t) for r, t in zip(Rp, tp)) / len(Rp)
    return one(Rp, tp)


if __name__ == "__main__":
    key = jax.random.PRNGKey(0)
    B, N = 2, 64  # batch of 2 point clouds, 64 points each, 3-D coords

    ks = jax.random.split(key, 6)
    source_pc = jax.random.normal(ks[0], (B, N, 3), dtype=jnp.float32)
    R_gt = jax.random.normal(ks[1], (B, 3, 3), dtype=jnp.float32)
    t_gt = jax.random.normal(ks[2], (B, 3), dtype=jnp.float32)
    R_pred = jax.random.normal(ks[3], (B, 3, 3), dtype=jnp.float32)
    t_pred = jax.random.normal(ks[4], (B, 3), dtype=jnp.float32)

    predictions = {'R_pred': R_pred, 't_pred': t_pred}
    ground_truth = {'R_gt': R_gt, 't_gt': t_gt, 'source_pc': source_pc}

    out = regression_distance_loss(predictions, ground_truth)
    loss = jax.block_until_ready(out['loss'])
    ref = jax.block_until_ready(_reference(predictions, ground_truth))
    assert jnp.allclose(loss, ref, rtol=1e-4, atol=1e-4), (loss, ref)

    # Tuple-of-predictions branch (iterative refinement case) — fused into one kernel call.
    preds_tuple = {'R_pred': (R_pred, R_gt), 't_pred': (t_pred, t_gt)}
    out2 = regression_distance_loss(preds_tuple, ground_truth)
    loss2 = jax.block_until_ready(out2['loss'])
    ref2 = jax.block_until_ready(_reference(preds_tuple, ground_truth))
    assert jnp.allclose(loss2, ref2, rtol=1e-4, atol=1e-4), (loss2, ref2)

    print("KERNEL_OK")
</pallas_src>

<mosaic_0001>
module attributes {stable_mosaic.version = 11 : i64} {
  func.func @kernel(%arg0: i32, %arg1: i32, %arg2: memref<2x12xf32, #tpu.memory_space<smem>>, %arg3: memref<1x3x8x128xf32, #tpu.memory_space<vmem>>, %arg4: memref<1x8x128xf32, #tpu.memory_space<vmem>>) attributes {dimension_semantics = [#tpu.dimension_semantics<parallel>, #tpu.dimension_semantics<arbitrary>], iteration_bounds = array<i64: 2, 1>, scalar_prefetch = 0 : i64, scratch_operands = 0 : i64, tpu.core_type = #tpu.core_type<tc>, window_params = [{transform_indices = @transform_0, window_bounds = array<i64: 2, 12>}, {transform_indices = @transform_1, window_bounds = array<i64: 1, 3, 8, 128>}, {transform_indices = @transform_2, window_bounds = array<i64: 1, 8, 128>}]} {
    %c0_i32 = arith.constant 0 : i32
    %0 = arith.cmpi eq, %arg1, %c0_i32 : i32
    %1 = arith.extui %0 : i1 to i32
    %c0_i32_0 = arith.constant 0 : i32
    %2 = arith.cmpi ne, %1, %c0_i32_0 : i32
    scf.if %2 {
      %cst_19 = arith.constant 0.000000e+00 : f32
      %87 = vector.broadcast %cst_19 : f32 to vector<1x8x128xf32>
      %c0_20 = arith.constant 0 : index
      %c0_21 = arith.constant 0 : index
      %c0_22 = arith.constant 0 : index
      %88 = vector.load %arg4[%c0_20, %c0_21, %c0_22] : memref<1x8x128xf32, #tpu.memory_space<vmem>>, vector<1x8x128xf32>
      tpu.vector_store %arg4[%c0_20, %c0_21, %c0_22], %87 {strides = array<i32>} : memref<1x8x128xf32, #tpu.memory_space<vmem>>, vector<1x8x128xf32>,
    } else {
    }
    %c0 = arith.constant 0 : index
    %c0_1 = arith.constant 0 : index
    %c0_2 = arith.constant 0 : index
    %c0_3 = arith.constant 0 : index
    %3 = vector.load %arg3[%c0, %c0_1, %c0_2, %c0_3] : memref<1x3x8x128xf32, #tpu.memory_space<vmem>>, vector<1x1x8x128xf32>
    %4 = vector.shape_cast %3 : vector<1x1x8x128xf32> to vector<8x128xf32>
    %c0_4 = arith.constant 0 : index
    %c1 = arith.constant 1 : index
    %c0_5 = arith.constant 0 : index
    %c0_6 = arith.constant 0 : index
    %5 = vector.load %arg3[%c0_4, %c1, %c0_5, %c0_6] : memref<1x3x8x128xf32, #tpu.memory_space<vmem>>, vector<1x1x8x128xf32>
    %6 = vector.shape_cast %5 : vector<1x1x8x128xf32> to vector<8x128xf32>
    %c0_7 = arith.constant 0 : index
    %c2 = arith.constant 2 : index
    %c0_8 = arith.constant 0 : index
    %c0_9 = arith.constant 0 : index
    %7 = vector.load %arg3[%c0_7, %c2, %c0_8, %c0_9] : memref<1x3x8x128xf32, #tpu.memory_space<vmem>>, vector<1x1x8x128xf32>
    %8 = vector.shape_cast %7 : vector<1x1x8x128xf32> to vector<8x128xf32>
    %9 = tpu.iota {dimensions = array<i32: 0>} : vector<8x128xi32>
    %10 = tpu.iota {dimensions = array<i32: 1>} : vector<8x128xi32>
    %c1024_i32 = arith.constant 1024 : i32
    %11 = arith.muli %arg1, %c1024_i32 : i32
    %c128_i32 = arith.constant 128 : i32
    %12 = vector.broadcast %c128_i32 : i32 to vector<8x128xi32>
    %13 = arith.muli %9, %12 : vector<8x128xi32>
    %14 = vector.broadcast %11 : i32 to vector<8x128xi32>
    %15 = arith.addi %14, %13 : vector<8x128xi32>
    %16 = arith.addi %15, %10 : vector<8x128xi32>
    %c64_i32 = arith.constant 64 : i32
    %17 = vector.broadcast %c64_i32 : i32 to vector<8x128xi32>
    %18 = arith.cmpi slt, %16, %17 : vector<8x128xi32>
    %19 = arith.extui %18 : vector<8x128xi1> to vector<8x128xi32>
    %20 = arith.sitofp %19 : vector<8x128xi32> to vector<8x128xf32>
    %cst = arith.constant 0.000000e+00 : f32
    %21 = vector.broadcast %cst : f32 to vector<8x128xf32>
    %22 = arith.index_cast %arg0 : i32 to index
    %c0_10 = arith.constant 0 : index
    %23 = memref.load %arg2[%22, %c0_10] : memref<2x12xf32, #tpu.memory_space<smem>>
    %24 = arith.index_cast %arg0 : i32 to index
    %c1_11 = arith.constant 1 : index
    %25 = memref.load %arg2[%24, %c1_11] : memref<2x12xf32, #tpu.memory_space<smem>>
    %26 = arith.index_cast %arg0 : i32 to index
    %c2_12 = arith.constant 2 : index
    %27 = memref.load %arg2[%26, %c2_12] : memref<2x12xf32, #tpu.memory_space<smem>>
    %28 = arith.index_cast %arg0 : i32 to index
    %c3 = arith.constant 3 : index
    %29 = memref.load %arg2[%28, %c3] : memref<2x12xf32, #tpu.memory_space<smem>>
    %30 = vector.broadcast %23 : f32 to vector<8x128xf32>
    %31 = arith.mulf %30, %4 : vector<8x128xf32>
    %32 = vector.broadcast %25 : f32 to vector<8x128xf32>
    %33 = arith.mulf %32, %6 : vector<8x128xf32>
    %34 = arith.addf %31, %33 : vector<8x128xf32>
    %35 = vector.broadcast %27 : f32 to vector<8x128xf32>
    %36 = arith.mulf %35, %8 : vector<8x128xf32>
    %37 = arith.addf %34, %36 : vector<8x128xf32>
    %38 = vector.broadcast %29 : f32 to vector<8x128xf32>
    %39 = arith.addf %37, %38 : vector<8x128xf32>
    %40 = math.absf %39 : vector<8x128xf32>
    %41 = arith.addf %21, %40 : vector<8x128xf32>
    %42 = arith.index_cast %arg0 : i32 to index
    %c4 = arith.constant 4 : index
    %43 = memref.load %arg2[%42, %c4] : memref<2x12xf32, #tpu.memory_space<smem>>
    %44 = arith.index_cast %arg0 : i32 to index
    %c5 = arith.constant 5 : index
    %45 = memref.load %arg2[%44, %c5] : memref<2x12xf32, #tpu.memory_space<smem>>
    %46 = arith.index_cast %arg0 : i32 to index
    %c6 = arith.constant 6 : index
    %47 = memref.load %arg2[%46, %c6] : memref<2x12xf32, #tpu.memory_space<smem>>
    %48 = arith.index_cast %arg0 : i32 to index
    %c7 = arith.constant 7 : index
    %49 = memref.load %arg2[%48, %c7] : memref<2x12xf32, #tpu.memory_space<smem>>
    %50 = vector.broadcast %43 : f32 to vector<8x128xf32>
    %51 = arith.mulf %50, %4 : vector<8x128xf32>
    %52 = vector.broadcast %45 : f32 to vector<8x128xf32>
    %53 = arith.mulf %52, %6 : vector<8x128xf32>
    %54 = arith.addf %51, %53 : vector<8x128xf32>
    %55 = vector.broadcast %47 : f32 to vector<8x128xf32>
    %56 = arith.mulf %55, %8 : vector<8x128xf32>
    %57 = arith.addf %54, %56 : vector<8x128xf32>
    %58 = vector.broadcast %49 : f32 to vector<8x128xf32>
    %59 = arith.addf %57, %58 : vector<8x128xf32>
    %60 = math.absf %59 : vector<8x128xf32>
    %61 = arith.addf %41, %60 : vector<8x128xf32>
    %62 = arith.index_cast %arg0 : i32 to index
    %c8 = arith.constant 8 : index
    %63 = memref.load %arg2[%62, %c8] : memref<2x12xf32, #tpu.memory_space<smem>>
    %64 = arith.index_cast %arg0 : i32 to index
    %c9 = arith.constant 9 : index
    %65 = memref.load %arg2[%64, %c9] : memref<2x12xf32, #tpu.memory_space<smem>>
    %66 = arith.index_cast %arg0 : i32 to index
    %c10 = arith.constant 10 : index
    %67 = memref.load %arg2[%66, %c10] : memref<2x12xf32, #tpu.memory_space<smem>>
    %68 = arith.index_cast %arg0 : i32 to index
    %c11 = arith.constant 11 : index
    %69 = memref.load %arg2[%68, %c11] : memref<2x12xf32, #tpu.memory_space<smem>>
    %70 = vector.broadcast %63 : f32 to vector<8x128xf32>
    %71 = arith.mulf %70, %4 : vector<8x128xf32>
    %72 = vector.broadcast %65 : f32 to vector<8x128xf32>
    %73 = arith.mulf %72, %6 : vector<8x128xf32>
    %74 = arith.addf %71, %73 : vector<8x128xf32>
    %75 = vector.broadcast %67 : f32 to vector<8x128xf32>
    %76 = arith.mulf %75, %8 : vector<8x128xf32>
    %77 = arith.addf %74, %76 : vector<8x128xf32>
    %78 = vector.broadcast %69 : f32 to vector<8x128xf32>
    %79 = arith.addf %77, %78 : vector<8x128xf32>
    %80 = math.absf %79 : vector<8x128xf32>
    %81 = arith.addf %61, %80 : vector<8x128xf32>
    %82 = arith.mulf %81, %20 : vector<8x128xf32>
    %c0_13 = arith.constant 0 : index
    %c0_14 = arith.constant 0 : index
    %c0_15 = arith.constant 0 : index
    %83 = vector.load %arg4[%c0_13, %c0_14, %c0_15] : memref<1x8x128xf32, #tpu.memory_space<vmem>>, vector<1x8x128xf32>
    %84 = vector.shape_cast %82 : vector<8x128xf32> to vector<1x8x128xf32>
    %85 = arith.addf %83, %84 : vector<1x8x128xf32>
    %c0_16 = arith.constant 0 : index
    %c0_17 = arith.constant 0 : index
    %c0_18 = arith.constant 0 : index
    %86 = vector.load %arg4[%c0_16, %c0_17, %c0_18] : memref<1x8x128xf32, #tpu.memory_space<vmem>>, vector<1x8x128xf32>
    tpu.vector_store %arg4[%c0_16, %c0_17, %c0_18], %85 {strides = array<i32>} : memref<1x8x128xf32, #tpu.memory_space<vmem>>, vector<1x8x128xf32>,
    return
  }
  func.func @transform_0(%arg0: i32, %arg1: i32) -> (i32, i32) {
    %c0_i32 = arith.constant 0 : i32
    %c0_i32_0 = arith.constant 0 : i32
    %c0_i32_1 = arith.constant 0 : i32
    return %c0_i32, %c0_i32_0 : i32, i32
  }
  func.func @transform_1(%arg0: i32, %arg1: i32) -> (i32, i32, i32, i32) {
    %c0_i32 = arith.constant 0 : i32
    %c0_i32_0 = arith.constant 0 : i32
    %c0_i32_1 = arith.constant 0 : i32
    return %arg0, %c0_i32, %arg1, %c0_i32_0 : i32, i32, i32, i32
  }
  func.func @transform_2(%arg0: i32, %arg1: i32) -> (i32, i32, i32) {
    %c0_i32 = arith.constant 0 : i32
    %c0_i32_0 = arith.constant 0 : i32
    %c0_i32_1 = arith.constant 0 : i32
    return %arg0, %c0_i32, %c0_i32_0 : i32, i32, i32
  }
}

</mosaic_0001>

<bundles_post_ra>
// kernel: tpu_custom_call.1
= control target key start
LH: loop header
LB: loop body
LE: loop exit
PB: predicated region body
PF: predicated region fallthrough
CT: control target
= control target key end

     0   :  { %7 = vsyncpa [#allocation5], 0  ;;  %s850_s0 = inlined_call_operand.hbm [shape: f32[2,12], index: 0, kind: input, shape index: {}]   ;;  %s851_s1 = inlined_call_operand.hbm [shape: f32[2,3,8,128], index: 1, kind: input, shape index: {}]   ;;  %s852_s2 = inlined_call_operand.hbm [shape: f32[2,8,128], index: 2, kind: output, shape index: {}]  }
   0x1   :  { %8 = vsyncpa [#allocation3], 0 }
   0x2   :  { %10 = vsyncpa [#allocation3 + $0x1], 0 }
   0x3   :  { %11 = vsyncpa [#allocation4], 0 }
   0x4   :  { %13 = vsyncpa [#allocation4 + $0x1], 0  ;;  %s629_s9 = smov 0   ;;  %s631_s10 = smov 0  }
   0x5   :  { %s633_s11 = smov 0   ;;  %s635_s12 = smov 0  }
   0x6   :  { %s637_s13 = smov 0   ;;  %s639_s14 = smov 0  }
   0x7 LB: > { %s381_s15 = sadd.s32 4294967295, %s606_s14   ;;  %s382_s16 = sadd.s32 4294967294, %s606_s14   ;;  %s606_s14 = sphi %s639_s14, %s19_s14   ;;  %s602_s13 = sphi %s637_s13, %s872_s13   ;;  %s598_s12 = sphi %s635_s12, %s871_s12   ;;  %s594_s11 = sphi %s633_s11, %s870_s11   ;;  %s590_s10 = sphi %s631_s10, %s869_s10   ;;  %s586_s9 = sphi %s629_s9, %s868_s9  }
   0x8   : > { %s61_s17 = sadd.s32 1, %s594_s11  ;;  %p68_p0 = scmp.ne.s32.totalorder %s594_s11, %s590_s10 }
   0x9   : > { %p69_p1 = scmp.eq.s32.totalorder %s606_s14, 0  ;;  %p74_p2 = scmp.ne.s32.totalorder %s590_s10, %s586_s9 }
   0xa   : > { %p667_p3 = scmp.eq.s32.totalorder %s381_s15, 0  ;;  %p98_p4 = scmp.eq.s32.totalorder %s381_s15, 1 }
   0xb   : > { %p70_p5 = por %p69_p1, %p68_p0  ;;  %p104_p6 = scmp.eq.s32.totalorder %s382_s16, 1 }
   0xc   : > { %s857_s18 = scalar_select %p667_p3, 1, 0 }
   0xd   : > { %p673_p7 = por %p667_p3, %p74_p2  ;;  %p677_p8 = por %p98_p4, %p68_p0 }
   0xe   : > { %p681_p9 = por %p104_p6, %p74_p2  ;;  %p383_p10 = scmp.ge.s32.totalorder %s606_s14, 1 }
   0xf   : > { %s858_s19 = scalar_select %p673_p7, 1, 0 }
  0x10   : > { %s859_s20 = scalar_select %p677_p8, 1, 0 }
  0x11   : > { %s860_s21 = scalar_select %p681_p9, 1, 0 }
  0x12   : > { %p111_p11 = scmp.lt.s32.totalorder %s606_s14, 3  ;;  %p422_p1 = scmp.lt.s32.totalorder %s606_s14, 2 }
  0x13   : > { %s133_s23 = sand.u32 1, %s594_s11   ;;  %s31_s25 = sadd.s32 1, %s602_s13 }
  0x14   : > { %p688_p13 = pnand %p383_p10, %p111_p11  ;;  %p696_p0 = pnand %p422_p1, %p70_p5 }
  0x15   : > { %s398_s26 = smul.u32 24, %s133_s23  ;;  %p33_p4 = scmp.ge.s32.totalorder %s31_s25, 2 }
  0x16   : > { %p409_p7 = pneg %p688_p13  ;;  %s477_s29 = scalar_lea.hbm %s850_s0, 32 }
  0x17   : > { %p478_p6 = scmp.ne.s32.totalorder %s850_s0, %s477_s29  ;;  %p484_p5 = scmp.lt.u32.totalorder %s477_s29, %s850_s0 }
  0x18   : > { %p410_p2 = pnand %p409_p7, %p667_p3 }
  0x1a   : > { %p479_p10 = pneg %p410_p2 }
  0x1c   : > { %p480_p11 = pnand %p479_p10, %p478_p6 }
  0x1e   : > { %p481_p12 = pneg %p480_p11 }
  0x20   : > { %p486_p1 = pnand %p484_p5, %p481_p12 }
  0x22   : > { %489 = shalt.err (!%p486_p1)
}
  0x23   : > { %s608_s6 = smov [#allocation2]   ;;  %s874_s25 = smov (%p33_p4, %s31_s25), 0 }
  0x24   : > { %412 = dma.hbm_to_smem (!%p410_p2), %s850_s0, 32, %s608_s6, [#allocation5]  }
  0x25   : > { %s399_s15 = smul.u32 384, %s602_s13  ;;  %s56_s16 = ssub.s32 %s602_s13, %s874_s25 }
  0x26   : > { %s137_s27 = scalar_lea.vmem [#allocation6], %s398_s26  ;;  %p59_p7 = scmp.eq.s32.totalorder %s56_s16, 0 }
  0x27   : > { %s145_s28 = sshll.u32 %s137_s27, 4  ;;  %s723_s3 = scalar_lea.hbm %s851_s1, %s399_s15  ;;  %s725_s28 = int_to_ptr.vmem [resolvable:$true] %s145_s28 }
  0x28   : > { %s730_s4 = scalar_select %p59_p7, %s594_s11, %s61_s17  }
  0x29   : > { %s732_s5 = scalar_lea.sflag [#allocation3], %s133_s23  ;;  %s490_s6 = scalar_lea.hbm %s723_s3, 384 }
  0x2a   : > { %p491_p12 = scmp.ne.s32.totalorder %s723_s3, %s490_s6  ;;  %p492_p2 = pneg %p696_p0 }
  0x2b   : > { %s495_s8 = scalar_lea.hbm %s851_s1, 768  ;;  %p496_p10 = scmp.lt.u32.totalorder %s723_s3, %s851_s1 }
  0x2c   : > { %p493_p4 = pnand %p492_p2, %p491_p12  ;;  %p497_p11 = scmp.lt.u32.totalorder %s495_s8, %s490_s6 }
  0x2d   : > { %p499_p1 = scmp.lt.u32.totalorder %s490_s6, %s723_s3 }
  0x2e   : > { %p494_p6 = pneg %p493_p4  ;;  %p498_p5 = por %p497_p11, %p496_p10 }
  0x30   : > { %p500_p7 = por %p499_p1, %p498_p5 }
  0x32   : > { %p501_p9 = pnand %p500_p7, %p494_p6 }
  0x34   : > { %504 = shalt.err (!%p501_p9)
}
  0x35   : > { %s505_s17 = scalar_lea.vmem %s725_s28, 384  ;;  %s609_s23 = smov [#allocation6]  }
  0x36   : > { %p506_p12 = scmp.ne.s32.totalorder %s725_s28, %s505_s17  ;;  %s510_s27 = sshll.u32 %s609_s23, 4  ;;  %s511_s27 = int_to_ptr.vmem [resolvable:$false] %s510_s27 }
  0x37   : > { %s512_s29 = scalar_lea.vmem %s511_s27, 768  ;;  %p513_p3 = scmp.lt.s32.totalorder %s725_s28, %s511_s27 }
  0x38   : > { %p508_p4 = pnand %p506_p12, %p492_p2  ;;  %p514_p10 = scmp.lt.s32.totalorder %s512_s29, %s505_s17 }
  0x3a   : > { %p509_p8 = pneg %p508_p4  ;;  %p515_p11 = por %p514_p10, %p513_p3 }
  0x3c   : > { %p516_p5 = pnand %p515_p11, %p509_p8 }
  0x3e   : > { %519 = shalt.err (!%p516_p5)
}
  0x3f   : > { %s610_s30 = smov 128   ;;  %s611_s6 = smov 8  }
  0x40   : > { %416 = dma.hbm_to_vmem [thread:$0]  (!%p696_p0), %s723_s3, 384, %s725_s28, %s732_s5, %s610_s30, %s610_s30, %s611_s6  }
  0x41   : > { %157 = sbr.rel (%p688_p13) target bundleno = 125 (0x7d), region = 28  ;;  %p863_p9 = scmp.ne.s32.totalorder (!%p688_p13), %s857_s18, 0 }
  0x48   : > { %573 = dma.done.wait (%p863_p9), [#allocation5], 32  }
  0x49   : > { %575 = vsyncadd (%p863_p9), [#allocation5], 4294967264  ;;  %s767_s26 = sand.u32 1, %s590_s10   ;;  %p864_p3 = scmp.ne.s32.totalorder %s858_s19, 0 }
  0x4a   : > { %s400_s7 = smul.u32 24, %s767_s26  ;;  %s164_s8 = scalar_lea.sflag [#allocation3], %s767_s26 }
  0x4c   : > { %s167_s15 = scalar_lea.vmem [#allocation6], %s400_s7 }
  0x4d   : > { %577 = dma.done.wait (%p864_p3), %s164_s8, 384  }
  0x4e   : > { %579 = vsyncadd (%p864_p3), %s164_s8, 4294966912 }
  0x4f   : > { %172 = sfence }
  0x50   : > { %s776_s22 = sshll.u32 %s598_s12, 7  ;;  %v194_v0 = vld [vmem:[%s167_s15] sm:$0xff]  ;;  %v390_v1 = vld [vmem:[%s167_s15 + $0x8] sm:$0xff]  ;;  %v391_v2 = vld [vmem:[%s167_s15 + $0x10] sm:$0xff]  ;;  %v199_v4 = vlaneseq  ;;  %v612_v42 = vmov 0.0   ;;  %p865_p13 = scmp.ne.s32.totalorder %s859_s20, 0 }
  0x51   : > { %s212_s18 = sld [smem:[#allocation2 + %s776_s22]]  ;;  %s213_s24 = sadd.s32 1, %s776_s22 }
  0x52   : > { %s215_s28 = sadd.s32 2, %s776_s22  ;;  %s214_s3 = sld [smem:[#allocation2 + %s213_s24]]  ;;  %v200_v11 = vshrl.u32 %v199_v4, 7  ;;  %v202_v20 = vand.u32 127, %v199_v4 }
  0x53   : > { %s216_s5 = sld [smem:[#allocation2 + %s215_s28]]  ;;  %s217_s19 = sadd.s32 3, %s776_s22 }
  0x54   : > { %s231_s16 = sadd.s32 4, %s776_s22  ;;  %s783_s17 = sld [smem:[#allocation2 + %s217_s19]]  ;;  %v204_v22 = vmul.u32 128, %v200_v11 }
  0x55   : > { %s232_s12 = sld [smem:[#allocation2 + %s231_s16]]  ;;  %s233_s23 = sadd.s32 5, %s776_s22 }
  0x56   : > { %s235_s27 = sadd.s32 6, %s776_s22  ;;  %s234_s29 = sld [smem:[#allocation2 + %s233_s23]]  ;;  %v207_v32 = vadd.s32 %v204_v22, %v202_v20 }
  0x57   : > { %v219_v3 = vstv %s212_s18  ;;  %s236_s30 = sld [smem:[#allocation2 + %s235_s27]]  ;;  %s237_s6 = sadd.s32 7, %s776_s22 }
  0x58   : > { %v220_v5 = vmul.f32 %v219_v3, %v194_v0  ;;  %s251_s7 = sadd.s32 8, %s776_s22  ;;  %v221_v6 = vstv %s214_s3  ;;  %s789_s8 = sld [smem:[#allocation2 + %s237_s6]]  ;;  %vm208_vm0 = vcmp.lt.s32.totalorder %v207_v32, 64 }
  0x59   : > { %v224_v7 = vstv %s216_s5  ;;  %s252_s24 = sld [smem:[#allocation2 + %s251_s7]]  ;;  %v222_v8 = vmul.f32 %v390_v1, %v221_v6  ;;  %s253_s28 = sadd.s32 9, %s776_s22  ;;  %v392_v43 = vsel %vm208_vm0, 1.0, %v612_v42 }
  0x5a   : > { %v225_v9 = vmul.f32 %v391_v2, %v224_v7  ;;  %s255_s19 = sadd.s32 10, %s776_s22  ;;  %s254_s15 = sld [smem:[#allocation2 + %s253_s28]]  ;;  %v227_v14 = vstv %s783_s17 }
  0x5b   : > { %v239_v10 = vstv %s232_s12  ;;  %s256_s18 = sld [smem:[#allocation2 + %s255_s19]]  ;;  %v223_v12 = vadd.f32 %v222_v8, %v220_v5  ;;  %s257_s16 = sadd.s32 11, %s776_s22 }
  0x5c   : > { %v240_v13 = vmul.f32 %v239_v10, %v194_v0  ;;  %v241_v15 = vstv %s234_s29  ;;  %s258_s3 = sld [smem:[#allocation2 + %s257_s16]]  ;;  %s389_s5 = sshll.u32 %s767_s26, 3 }
  0x5d   : > { %v244_v16 = vstv %s236_s30  ;;  %v226_v17 = vadd.f32 %v225_v9, %v223_v12  ;;  %v242_v18 = vmul.f32 %v390_v1, %v241_v15  ;;  %s188_s17 = scalar_lea.vmem [#allocation7], %s389_s5  ;;  %s801_s29 = scalar_lea.hbm %s852_s2, %s776_s22 }
  0x5e   : > { %v245_v19 = vmul.f32 %v391_v2, %v244_v16  ;;  %v247_v26 = vstv %s789_s8  ;;  %s289_s12 = sshll.u32 %s188_s17, 4  ;;  %s276_s30 = scalar_lea.sflag [#allocation4], %s767_s26  ;;  %s803_s12 = int_to_ptr.vmem [resolvable:$true] %s289_s12 }
  0x5f   : > { %v259_v21 = vstv %s252_s24  ;;  %v228_v23 = vadd.f32 %v227_v14, %v226_v17  ;;  %v243_v24 = vadd.f32 %v242_v18, %v240_v13  ;;  %s520_s6 = scalar_lea.vmem %s803_s12, 128  ;;  %s613_s7 = smov [#allocation7]  }
  0x60   : > { %v260_v25 = vmul.f32 %v259_v21, %v194_v0  ;;  %v261_v27 = vstv %s254_s15  ;;  %p521_p8 = scmp.ne.s32.totalorder %s803_s12, %s520_s6  ;;  %s524_s8 = sshll.u32 %s613_s7, 4  ;;  %s525_s8 = int_to_ptr.vmem [resolvable:$false] %s524_s8 }
  0x61   : > { %v264_v28 = vstv %s256_s18  ;;  %v246_v29 = vadd.f32 %v245_v19, %v243_v24  ;;  %v262_v30 = vmul.f32 %v390_v1, %v261_v27  ;;  %v229_v33 = vand.u32 2147483647, %v228_v23  ;;  %s526_s24 = scalar_lea.vmem %s525_s8, 256  ;;  %p527_p6 = scmp.lt.s32.totalorder %s803_s12, %s525_s8 }
  0x62   : > { %v265_v31 = vmul.f32 %v391_v2, %v264_v28  ;;  %v267_v36 = vstv %s258_s3  ;;  %p522_p0 = pnand %p521_p8, %p865_p13  ;;  %p528_p1 = scmp.lt.s32.totalorder %s526_s24, %s520_s6 }
  0x63   : > { %v248_v34 = vadd.f32 %v247_v26, %v246_v29  ;;  %v263_v35 = vadd.f32 %v262_v30, %v260_v25 }
  0x64   : > { %p523_p2 = pneg %p522_p0  ;;  %p529_p7 = por %p528_p1, %p527_p6 }
  0x65   : > { %v249_v37 = vand.u32 2147483647, %v248_v34  ;;  %v266_v38 = vadd.f32 %v265_v31, %v263_v35 }
  0x66   : > { %p530_p12 = pnand %p529_p7, %p523_p2 }
  0x67   : > { %v250_v39 = vadd.f32 %v249_v37, %v229_v33  ;;  %v268_v40 = vadd.f32 %v267_v36, %v266_v38 }
  0x69   : > { %v269_v41 = vand.u32 2147483647, %v268_v40 }
  0x6b   : > { %v270_v44 = vadd.f32 %v269_v41, %v250_v39 }
  0x6d   : > { %v271_v45 = vmul.f32 %v392_v43, %v270_v44 }
  0x6f   : > { %274 = vst [vmem:[%s188_s17] sm:$0xff] %v271_v45 }
  0x70   : > { %533 = shalt.err (!%p530_p12)
}
  0x71   : > { %s534_s26 = scalar_lea.hbm %s801_s29, 128  ;;  %s538_s19 = scalar_lea.hbm %s852_s2, 256 }
  0x72   : > { %p535_p4 = scmp.ne.s32.totalorder %s801_s29, %s534_s26  ;;  %p539_p5 = scmp.lt.u32.totalorder %s801_s29, %s852_s2 }
  0x73   : > { %p540_p9 = scmp.lt.u32.totalorder %s538_s19, %s534_s26  ;;  %p542_p8 = scmp.lt.u32.totalorder %s534_s26, %s801_s29 }
  0x74   : > { %p536_p10 = pnand %p535_p4, %p865_p13 }
  0x75   : > { %p541_p3 = por %p540_p9, %p539_p5 }
  0x76   : > { %p537_p11 = pneg %p536_p10 }
  0x77   : > { %p543_p0 = por %p542_p8, %p541_p3 }
  0x79   : > { %p544_p2 = pnand %p543_p0, %p537_p11 }
  0x7b   : > { %547 = shalt.err (!%p544_p2)
}
  0x7c   : > { %407 = dma.vmem_to_hbm [thread:$0]  (%p865_p13), %s803_s12, 128, %s801_s29, %s276_s30  }
  0x7d PF: > { %s301_s16 = sand.u32 1, %s586_s9   ;;  %p866_p6 = scmp.ne.s32.totalorder %s860_s21, 0 }
  0x7e   : > { %p867_p1 = scmp.ge.s32.totalorder %s606_s14, 2  ;;  %s302_s3 = scalar_lea.sflag [#allocation4], %s301_s16 }
  0x80   : > { %p418_p7 = pnand %p867_p1, %p866_p6 }
  0x82   : > { %581 = dma.done.wait (!%p418_p7), %s302_s3, 128  }
  0x83   : > { %583 = vsyncadd (!%p418_p7), %s302_s3, 4294967168  ;;  %s19_s14 = sadd.s32 1, %s606_s14   ;;  %s868_s9 = smov %s590_s10 }
  0x84   : > { %p16_p12 = scmp.ge.s32.totalorder %s19_s14, 4   ;;  %s869_s10 = smov %s594_s11 }
  0x85   : > { %s870_s11 = smov %s730_s4  ;;  %s871_s12 = smov %s602_s13 }
  0x86   : > { %s872_s13 = smov %s874_s25  ;;  %18 = sbr.rel (!%p16_p12) target bundleno = 7 (0x7), region = 84 }
  0x8d   :  { %307 = vsyncpa [#allocation3], 1 }
  0x8e   :  { %309 = vsyncpa [#allocation3 + $0x1], 1 }
  0x8f   :  { %310 = vsyncpa [#allocation4], 1 }
  0x90   :  { %312 = vsyncpa [#allocation4 + $0x1], 1 }
  0x91   :  { %313 = vsyncpa [#allocation5], 1 }
  0x92   :  { %315 = vsyncpa [#allocation5 + $0x1], 1 }

</bundles_post_ra>
